<compile_context>
chip_gen: v7x
topology: tpu7x:2x2x1
jax: 0.10.0
libtpu: 0.0.40
codegen_flags: <defaults>
</compile_context>

<pallas_src>
import math

import jax
import jax.numpy as jnp
from jax.experimental import pallas as pl
from jax.experimental.pallas import tpu as pltpu

_THETA = 0.6
_INV_LN2 = 1.0 / math.log(2.0)


def _make_sc_loss_kernel(alpha: float):
    """Kernel over one batch tile: emits (ce partial sum, ctste partial sum)."""
    power = -(alpha + 1.0) * 0.5
    inv_alpha = 1.0 / alpha

    def kernel(x_ref, tgt_ref, yi_ref, yj_ref, yk_ref, mask_ref,
               ce_ref, ct_ref):
        x = x_ref[...].astype(jnp.float32)                       # [TB, C]
        rmask = mask_ref[...]                                    # [TB, 1]

        # ---- cross-entropy partial: sum_rows (logsumexp - x[target]) ----
        m = jnp.max(x, axis=-1, keepdims=True)
        lse = m + jnp.log(jnp.sum(jnp.exp(x - m), axis=-1, keepdims=True))
        cls = jax.lax.broadcasted_iota(jnp.int32, x.shape, 1)
        picked = jnp.sum(jnp.where(cls == tgt_ref[...], x, 0.0),
                         axis=-1, keepdims=True)
        ce_sum = jnp.sum((lse - picked) * rmask)

        # ---- t-STE partial: sum log2 pijk, softplus form ----
        yi = yi_ref[...].astype(jnp.float32)                     # [TB, 1]
        yj = yj_ref[...].astype(jnp.float32)                     # [TB, Mp]
        yk = yk_ref[...].astype(jnp.float32)                     # [TB, Mp]
        dij = yi - yj
        dik = yi - yk
        lij = jnp.log(1.0 + dij * dij * inv_alpha)
        lik = jnp.log(1.0 + dik * dik * inv_alpha)
        z = power * (lik - lij)
        # log(pijk) = -softplus(z); stable softplus
        softplus = jnp.maximum(z, 0.0) + jnp.log(1.0 + jnp.exp(-jnp.abs(z)))
        row = jnp.sum(softplus, axis=-1, keepdims=True)          # [TB, 1]
        ct_sum = -jnp.sum(row * rmask) * _INV_LN2                # sum log2 pijk

        ce_ref[...] = jnp.full((1, 1, 1), ce_sum, dtype=ce_ref.dtype)
        ct_ref[...] = jnp.full((1, 1, 1), ct_sum, dtype=ct_ref.dtype)

    return kernel


def prepare_gathers(x, target, distance_rank, key):
    """Glue: the data-dependent index gathers from the PyTorch inner loop."""
    B, C = x.shape
    M = C - 3                                        # class_index = 2 .. C-2
    rank_t = distance_rank[target]                   # [B, C]
    i_idx = rank_t[:, 1]                             # yi index per row
    j_idx = rank_t[:, 2:C - 1]                       # [B, M]
    cls_idx = jnp.arange(2, C - 1, dtype=jnp.int32)  # [M]
    # randint(class_index + 1, class_num - 1) is inclusive on both ends.
    k_pos = jax.random.randint(key, (B, M),
                               minval=(cls_idx + 1)[None, :], maxval=C)
    k_idx = jnp.take_along_axis(rank_t, k_pos, axis=1)            # [B, M]

    yi = jnp.take_along_axis(x, i_idx[:, None], axis=1)           # [B, 1]
    yj = jnp.take_along_axis(x, j_idx, axis=1)                    # [B, M]
    yk = jnp.take_along_axis(x, k_idx, axis=1)                    # [B, M]
    return yi, yj, yk


def sc_loss_pallas(x, target, yi, yj, yk, *, tb=8, theta=_THETA):
    B, C = x.shape
    M = yj.shape[1]                                   # == C - 3
    Mp = pl.cdiv(M, 128) * 128                        # lane-dense pad
    Bp = pl.cdiv(B, tb) * tb
    G = Bp // tb
    n_pad_m = Mp - M

    x_p = jnp.pad(x, ((0, Bp - B), (0, 0)))                           # native dtype
    tgt_p = jnp.pad(target.astype(jnp.int32)[:, None], ((0, Bp - B), (0, 0)))
    yi_p = jnp.pad(yi.astype(jnp.float32), ((0, Bp - B), (0, 0)))
    yj_p = jnp.pad(yj.astype(jnp.float32), ((0, Bp - B), (0, Mp - M)))
    yk_p = jnp.pad(yk.astype(jnp.float32), ((0, Bp - B), (0, Mp - M)))
    rmask = jnp.pad(jnp.ones((B, 1), jnp.float32), ((0, Bp - B), (0, 0)))

    kernel = _make_sc_loss_kernel(alpha=float(C - 1))

    ce_p, ct_p = pl.pallas_call(
        kernel,
        grid=(G,),
        in_specs=[
            pl.BlockSpec((tb, C), lambda i: (i, 0)),     # logits
            pl.BlockSpec((tb, 1), lambda i: (i, 0)),     # target indices
            pl.BlockSpec((tb, 1), lambda i: (i, 0)),     # yi
            pl.BlockSpec((tb, Mp), lambda i: (i, 0)),    # yj (lane-dense)
            pl.BlockSpec((tb, Mp), lambda i: (i, 0)),    # yk (lane-dense)
            pl.BlockSpec((tb, 1), lambda i: (i, 0)),     # valid-row mask
        ],
        out_specs=(
            pl.BlockSpec((1, 1, 1), lambda i: (i, 0, 0)),
            pl.BlockSpec((1, 1, 1), lambda i: (i, 0, 0)),
        ),
        out_shape=(
            jax.ShapeDtypeStruct((G, 1, 1), jnp.float32),
            jax.ShapeDtypeStruct((G, 1, 1), jnp.float32),
        ),
        compiler_params=pltpu.CompilerParams(
            dimension_semantics=("parallel",)),
    )(x_p, tgt_p, yi_p, yj_p, yk_p, rmask)

    # Tiny final reduction + normalization (compile-time constants).
    ce = jnp.sum(ce_p) / B
    # Each padded lane on a valid row contributed exactly log2(1/2) = -1.
    ctste = jnp.sum(ct_p) + B * n_pad_m
    sc = -ctste / B / (C - 1)
    return theta * ce + (1.0 - theta) * sc


def sc_loss_ref(x, target, yi, yj, yk, theta=_THETA):
    """Pure-JAX reference matching the PyTorch math (same sampled k indices)."""
    B, C = x.shape
    alpha = C - 1
    logp = jax.nn.log_softmax(x, axis=-1)
    ce = -jnp.mean(logp[jnp.arange(B), target])
    power = -(alpha + 1) / 2
    midij = (1.0 + (yi - yj) ** 2 / alpha) ** power
    midik = (1.0 + (yi - yk) ** 2 / alpha) ** power
    pijk = midij / (midij + midik)
    ctste = jnp.sum(jnp.log2(pijk))
    sc = -ctste / B / (C - 1)
    return theta * ce + (1.0 - theta) * sc


if __name__ == "__main__":
    key = jax.random.PRNGKey(0)
    k_dist, k_x, k_tgt, k_rand = jax.random.split(key, 4)

    B, C = 32, 16   # batch, class_num

    # Deterministic stand-in for utils2.calculate_wordnet_distance:
    # symmetric positive distances, zero diagonal.
    d = jnp.abs(jax.random.normal(k_dist, (C, C))) + 0.1
    d = (d + d.T) / 2.0
    d = d * (1.0 - jnp.eye(C))
    distance_rank = jnp.argsort(d, axis=1)   # row c: [c, nearest class, ...]

    x = jax.random.normal(k_x, (B, C), dtype=jnp.float32)   # logits
    target = jax.random.randint(k_tgt, (B,), 0, C)

    yi, yj, yk = prepare_gathers(x, target, distance_rank, k_rand)

    loss = sc_loss_pallas(x, target, yi, yj, yk, tb=8)
    loss = jax.block_until_ready(loss)

    ref = sc_loss_ref(x, target, yi, yj, yk)
    assert jnp.allclose(loss, ref, rtol=1e-3, atol=1e-3), (loss, ref)

    print("KERNEL_OK")
</pallas_src>

<mosaic_0001>
module attributes {stable_mosaic.version = 11 : i64} {
  func.func @kernel(%arg0: i32, %arg1: memref<8x16xf32, #tpu.memory_space<vmem>>, %arg2: memref<8x1xi32, #tpu.memory_space<vmem>>, %arg3: memref<8x1xf32, #tpu.memory_space<vmem>>, %arg4: memref<8x128xf32, #tpu.memory_space<vmem>>, %arg5: memref<8x128xf32, #tpu.memory_space<vmem>>, %arg6: memref<8x1xf32, #tpu.memory_space<vmem>>, %arg7: memref<1x1x1xf32, #tpu.memory_space<vmem>>, %arg8: memref<1x1x1xf32, #tpu.memory_space<vmem>>) attributes {dimension_semantics = [#tpu.dimension_semantics<parallel>], iteration_bounds = array<i64: 4>, scalar_prefetch = 0 : i64, scratch_operands = 0 : i64, tpu.core_type = #tpu.core_type<tc>, window_params = [{transform_indices = @transform_0, window_bounds = array<i64: 8, 16>}, {transform_indices = @transform_1, window_bounds = array<i64: 8, 1>}, {transform_indices = @transform_2, window_bounds = array<i64: 8, 1>}, {transform_indices = @transform_3, window_bounds = array<i64: 8, 128>}, {transform_indices = @transform_4, window_bounds = array<i64: 8, 128>}, {transform_indices = @transform_5, window_bounds = array<i64: 8, 1>}, {transform_indices = @transform_6, window_bounds = array<i64: 1, 1, 1>}, {transform_indices = @transform_7, window_bounds = array<i64: 1, 1, 1>}]} {
    %c0 = arith.constant 0 : index
    %c0_0 = arith.constant 0 : index
    %0 = vector.load %arg1[%c0, %c0_0] : memref<8x16xf32, #tpu.memory_space<vmem>>, vector<8x16xf32>
    %c0_1 = arith.constant 0 : index
    %c0_2 = arith.constant 0 : index
    %1 = vector.load %arg6[%c0_1, %c0_2] : memref<8x1xf32, #tpu.memory_space<vmem>>, vector<8x1xf32>
    %cst = arith.constant dense<0xFF800000> : vector<8xf32>
    %2 = vector.multi_reduction <maximumf>, %0, %cst [1] : vector<8x16xf32> to vector<8xf32>
    %3 = vector.shape_cast %2 : vector<8xf32> to vector<8x1xf32>
    %4 = vector.broadcast %3 : vector<8x1xf32> to vector<8x16xf32>
    %5 = arith.subf %0, %4 : vector<8x16xf32>
    %6 = math.exp %5 : vector<8x16xf32>
    %cst_3 = arith.constant dense<0.000000e+00> : vector<8xf32>
    %7 = vector.multi_reduction <add>, %6, %cst_3 [1] : vector<8x16xf32> to vector<8xf32>
    %8 = vector.shape_cast %7 : vector<8xf32> to vector<8x1xf32>
    %9 = math.log %8 : vector<8x1xf32>
    %10 = arith.addf %3, %9 : vector<8x1xf32>
    %11 = tpu.iota {dimensions = array<i32: 1>} : vector<8x16xi32>
    %c0_4 = arith.constant 0 : index
    %c0_5 = arith.constant 0 : index
    %12 = vector.load %arg2[%c0_4, %c0_5] : memref<8x1xi32, #tpu.memory_space<vmem>>, vector<8x1xi32>
    %13 = vector.broadcast %12 : vector<8x1xi32> to vector<8x16xi32>
    %14 = arith.cmpi eq, %11, %13 : vector<8x16xi32>
    %cst_6 = arith.constant 0.000000e+00 : f32
    %15 = vector.broadcast %cst_6 : f32 to vector<8x16xf32>
    %16 = arith.select %14, %0, %15 : vector<8x16xi1>, vector<8x16xf32>
    %cst_7 = arith.constant dense<0.000000e+00> : vector<8xf32>
    %17 = vector.multi_reduction <add>, %16, %cst_7 [1] : vector<8x16xf32> to vector<8xf32>
    %18 = vector.shape_cast %17 : vector<8xf32> to vector<8x1xf32>
    %19 = arith.subf %10, %18 : vector<8x1xf32>
    %20 = arith.mulf %19, %1 : vector<8x1xf32>
    %21 = vector.shape_cast %20 : vector<8x1xf32> to vector<1x8x1xf32>
    %cst_8 = arith.constant dense<0.000000e+00> : vector<1xf32>
    %22 = vector.multi_reduction <add>, %21, %cst_8 [1, 2] : vector<1x8x1xf32> to vector<1xf32>
    %23 = vector.shape_cast %22 : vector<1xf32> to vector<1x1x1xf32>
    %24 = vector.extract %23[0, 0, 0] : f32 from vector<1x1x1xf32>
    %c0_9 = arith.constant 0 : index
    %c0_10 = arith.constant 0 : index
    %25 = vector.load %arg3[%c0_9, %c0_10] : memref<8x1xf32, #tpu.memory_space<vmem>>, vector<8x1xf32>
    %c0_11 = arith.constant 0 : index
    %c0_12 = arith.constant 0 : index
    %26 = vector.load %arg4[%c0_11, %c0_12] : memref<8x128xf32, #tpu.memory_space<vmem>>, vector<8x128xf32>
    %c0_13 = arith.constant 0 : index
    %c0_14 = arith.constant 0 : index
    %27 = vector.load %arg5[%c0_13, %c0_14] : memref<8x128xf32, #tpu.memory_space<vmem>>, vector<8x128xf32>
    %28 = vector.broadcast %25 : vector<8x1xf32> to vector<8x128xf32>
    %29 = arith.subf %28, %26 : vector<8x128xf32>
    %30 = vector.broadcast %25 : vector<8x1xf32> to vector<8x128xf32>
    %31 = arith.subf %30, %27 : vector<8x128xf32>
    %32 = arith.mulf %29, %29 : vector<8x128xf32>
    %cst_15 = arith.constant 0.0666666701 : f32
    %33 = vector.broadcast %cst_15 : f32 to vector<8x128xf32>
    %34 = arith.mulf %32, %33 : vector<8x128xf32>
    %cst_16 = arith.constant 1.000000e+00 : f32
    %35 = vector.broadcast %cst_16 : f32 to vector<8x128xf32>
    %36 = arith.addf %35, %34 : vector<8x128xf32>
    %37 = math.log %36 : vector<8x128xf32>
    %38 = arith.mulf %31, %31 : vector<8x128xf32>
    %cst_17 = arith.constant 0.0666666701 : f32
    %39 = vector.broadcast %cst_17 : f32 to vector<8x128xf32>
    %40 = arith.mulf %38, %39 : vector<8x128xf32>
    %cst_18 = arith.constant 1.000000e+00 : f32
    %41 = vector.broadcast %cst_18 : f32 to vector<8x128xf32>
    %42 = arith.addf %41, %40 : vector<8x128xf32>
    %43 = math.log %42 : vector<8x128xf32>
    %44 = arith.subf %43, %37 : vector<8x128xf32>
    %cst_19 = arith.constant -8.000000e+00 : f32
    %45 = vector.broadcast %cst_19 : f32 to vector<8x128xf32>
    %46 = arith.mulf %45, %44 : vector<8x128xf32>
    %cst_20 = arith.constant 0.000000e+00 : f32
    %47 = vector.broadcast %cst_20 : f32 to vector<8x128xf32>
    %48 = arith.maximumf %46, %47 : vector<8x128xf32>
    %49 = math.absf %46 : vector<8x128xf32>
    %cst_21 = arith.constant 0.000000e+00 : f32
    %50 = vector.broadcast %cst_21 : f32 to vector<8x128xf32>
    %51 = arith.subf %50, %49 : vector<8x128xf32>
    %52 = math.exp %51 : vector<8x128xf32>
    %cst_22 = arith.constant 1.000000e+00 : f32
    %53 = vector.broadcast %cst_22 : f32 to vector<8x128xf32>
    %54 = arith.addf %53, %52 : vector<8x128xf32>
    %55 = math.log %54 : vector<8x128xf32>
    %56 = arith.addf %48, %55 : vector<8x128xf32>
    %cst_23 = arith.constant dense<0.000000e+00> : vector<8xf32>
    %57 = vector.multi_reduction <add>, %56, %cst_23 [1] : vector<8x128xf32> to vector<8xf32>
    %58 = vector.shape_cast %57 : vector<8xf32> to vector<8x1xf32>
    %59 = arith.mulf %58, %1 : vector<8x1xf32>
    %60 = vector.shape_cast %59 : vector<8x1xf32> to vector<1x8x1xf32>
    %cst_24 = arith.constant dense<0.000000e+00> : vector<1xf32>
    %61 = vector.multi_reduction <add>, %60, %cst_24 [1, 2] : vector<1x8x1xf32> to vector<1xf32>
    %62 = vector.shape_cast %61 : vector<1xf32> to vector<1x1x1xf32>
    %63 = vector.extract %62[0, 0, 0] : f32 from vector<1x1x1xf32>
    %cst_25 = arith.constant 0.000000e+00 : f32
    %64 = arith.subf %cst_25, %63 : f32
    %cst_26 = arith.constant 1.44269502 : f32
    %65 = arith.mulf %64, %cst_26 : f32
    %66 = vector.broadcast %24 : f32 to vector<1x1x1xf32>
    %c0_27 = arith.constant 0 : index
    %c0_28 = arith.constant 0 : index
    %c0_29 = arith.constant 0 : index
    %67 = vector.load %arg7[%c0_27, %c0_28, %c0_29] : memref<1x1x1xf32, #tpu.memory_space<vmem>>, vector<1x1x1xf32>
    tpu.vector_store %arg7[%c0_27, %c0_28, %c0_29], %66 {strides = array<i32>} : memref<1x1x1xf32, #tpu.memory_space<vmem>>, vector<1x1x1xf32>,
    %68 = vector.broadcast %65 : f32 to vector<1x1x1xf32>
    %c0_30 = arith.constant 0 : index
    %c0_31 = arith.constant 0 : index
    %c0_32 = arith.constant 0 : index
    %69 = vector.load %arg8[%c0_30, %c0_31, %c0_32] : memref<1x1x1xf32, #tpu.memory_space<vmem>>, vector<1x1x1xf32>
    tpu.vector_store %arg8[%c0_30, %c0_31, %c0_32], %68 {strides = array<i32>} : memref<1x1x1xf32, #tpu.memory_space<vmem>>, vector<1x1x1xf32>,
    return
  }
  func.func @transform_0(%arg0: i32) -> (i32, i32) {
    %c0_i32 = arith.constant 0 : i32
    %c0_i32_0 = arith.constant 0 : i32
    return %arg0, %c0_i32 : i32, i32
  }
  func.func @transform_1(%arg0: i32) -> (i32, i32) {
    %c0_i32 = arith.constant 0 : i32
    %c0_i32_0 = arith.constant 0 : i32
    return %arg0, %c0_i32 : i32, i32
  }
  func.func @transform_2(%arg0: i32) -> (i32, i32) {
    %c0_i32 = arith.constant 0 : i32
    %c0_i32_0 = arith.constant 0 : i32
    return %arg0, %c0_i32 : i32, i32
  }
  func.func @transform_3(%arg0: i32) -> (i32, i32) {
    %c0_i32 = arith.constant 0 : i32
    %c0_i32_0 = arith.constant 0 : i32
    return %arg0, %c0_i32 : i32, i32
  }
  func.func @transform_4(%arg0: i32) -> (i32, i32) {
    %c0_i32 = arith.constant 0 : i32
    %c0_i32_0 = arith.constant 0 : i32
    return %arg0, %c0_i32 : i32, i32
  }
  func.func @transform_5(%arg0: i32) -> (i32, i32) {
    %c0_i32 = arith.constant 0 : i32
    %c0_i32_0 = arith.constant 0 : i32
    return %arg0, %c0_i32 : i32, i32
  }
  func.func @transform_6(%arg0: i32) -> (i32, i32, i32) {
    %c0_i32 = arith.constant 0 : i32
    %c0_i32_0 = arith.constant 0 : i32
    %c0_i32_1 = arith.constant 0 : i32
    return %arg0, %c0_i32, %c0_i32_0 : i32, i32, i32
  }
  func.func @transform_7(%arg0: i32) -> (i32, i32, i32) {
    %c0_i32 = arith.constant 0 : i32
    %c0_i32_0 = arith.constant 0 : i32
    %c0_i32_1 = arith.constant 0 : i32
    return %arg0, %c0_i32, %c0_i32_0 : i32, i32, i32
  }
}

</mosaic_0001>

<bundles_post_ra>
// kernel: tpu_custom_call.1
= control target key start
LH: loop header
LB: loop body
LE: loop exit
PB: predicated region body
PF: predicated region fallthrough
CT: control target
= control target key end

     0   :  { %s677_s24 = smov 0   ;;  %s728_s0 = inlined_call_operand.vmem [shape: f32[32,16], index: 0, kind: input, shape index: {}]   ;;  %s729_s1 = inlined_call_operand.vmem [shape: s32[32,1], index: 1, kind: input, shape index: {}]   ;;  %s730_s2 = inlined_call_operand.vmem [shape: f32[32,1], index: 2, kind: input, shape index: {}]   ;;  %s731_s3 = inlined_call_operand.vmem [shape: f32[32,128], index: 3, kind: input, shape index: {}]   ;;  %s732_s4 = inlined_call_operand.vmem [shape: f32[32,128], index: 4, kind: input, shape index: {}]   ;;  %s733_s5 = inlined_call_operand.vmem [shape: f32[32,1], index: 5, kind: input, shape index: {}]   ;;  %s734_s6 = inlined_call_operand.vmem [shape: f32[4,1,1], index: 6, kind: output, shape index: {0}]   ;;  %s735_s7 = inlined_call_operand.vmem [shape: f32[4,1,1], index: 7, kind: output, shape index: {1}]  }
   0x1 LB: > { %s588_s25 = sadd.s32 4294967295, %s634_s24   ;;  %p592_p0 = scmp.ge.s32.totalorder %s634_s24, 1  ;;  %s634_s24 = sphi %s677_s24, %s18_s24  }
   0x2   : > { %p284_p1 = scmp.lt.s32.totalorder %s634_s24, 5 }
   0x4   : > { %p285_p2 = pnand %p592_p0, %p284_p1 }
   0x5   : > { %p336_p3 = scmp.lt.s32.totalorder (!%p285_p2), %s588_s25, 3  ;;  %v636_v0 = vmov (!%p285_p2), 0   ;;  %vm368_vm0 = vcmask (!%p285_p2), 130048   ;;  %v381_v5 = vlaneseq (!%p285_p2)  ;;  %vm394_vm2 = vcmask (!%p285_p2), 7168  }
   0x6   : > { %288 = sbr.rel (%p285_p2) target bundleno = 579 (0x243), region = 44  ;;  %614 = vset.pattern.permute.xlu0 (!%p285_p2), %v636_v0  ;;  %615 = vset.pattern.permute.xlu1 (!%p285_p2), %v636_v0  ;;  %vm452_vm3 = vcmask (!%p285_p2), 0  }
   0x7   : > { %v382_v8 = vand.u32 (!%p285_p2), 127, %v381_v5 }
   0xd   : > { %s737_s25 = smov (!%p336_p3, %s588_s25), 3 }
   0xe   : > { %s688_s26 = sshll.u32 %s737_s25, 3 }
   0xf   : > { %s347_s29 = scalar_lea.vmem %s730_s2, %s688_s26  ;;  %s343_s9 = scalar_lea.vmem %s729_s1, %s688_s26 }
  0x10   : > { %v405_v1 = vld [vmem:[%s347_s29] sm:$0xff]  ;;  %s339_s12 = scalar_lea.vmem %s728_s0, %s688_s26  ;;  %s351_s15 = scalar_lea.vmem %s731_s3, %s688_s26 }
  0x11   : > { %410 = vperm.xlu0 %614, %v405_v1   ;;  %v383_v2 = vld [vmem:[%s343_s9] sm:$0xff]  ;;  %s355_s18 = scalar_lea.vmem %s732_s4, %s688_s26  ;;  %s359_s21 = scalar_lea.vmem %s733_s5, %s688_s26 }
  0x12   : > { %385 = vperm.xlu1 %615, %v383_v2   ;;  %v366_v3 = vld [vmem:[%s339_s12] sm:$0xff]  ;;  %s362_s26 = scalar_lea.vmem %s734_s6, %s737_s25  ;;  %s365_s9 = scalar_lea.vmem %s735_s7, %s737_s25 }
  0x13   : > { %v369_v4 = vsel %vm368_vm0, %v366_v3, -inf  ;;  %v406_v6 = vld [vmem:[%s351_s15] sm:$0xff] }
  0x14   : > { %v407_v7 = vld [vmem:[%s355_s18] sm:$0xff] }
  0x15   : > { %v367_v42 = vld [vmem:[%s359_s21] sm:$0xff] }
  0x30   : > { %370 = vmax.xlane.f32.xlu0 %v369_v4 }
  0x90   : > { %v411_v9 = vpop.permute.xlu0 %410 }
  0x91   : > { %v413_v10 = vsub.f32 %v411_v9, %v406_v6  ;;  %v414_v11 = vsub.f32 %v411_v9, %v407_v7  ;;  %v386_v12 = vpop.permute.xlu1 %385 }
  0x92   : > { %vm387_vm1 = vcmp.eq.s32.totalorder %v382_v8, %v386_v12 }
  0x93   : > { %v415_v13 = vmul.f32 %v413_v10, %v413_v10  ;;  %v420_v14 = vmul.f32 %v414_v11, %v414_v11  ;;  %v388_v15 = vsel %vm387_vm1, %v366_v3, 0.0 }
  0x94   : > { %v389_v16 = vsel %vm368_vm0, %v388_v15, 0.0 }
  0x95   : > { %v416_v17 = vmul.f32 0.06666667, %v415_v13  ;;  %v421_v18 = vmul.f32 0.06666667, %v420_v14  ;;  %390 = vadd.xlane.f32.xlu0 %v389_v16 }
  0x97   : > { %v417_v19 = vadd.f32 1.0, %v416_v17  ;;  %v422_v20 = vadd.f32 1.0, %v421_v18 }
  0x99   : > { %616 = vlog2.f32 %v417_v19 }
  0x9a   : > { %618 = vlog2.f32 %v422_v20 }
  0xa3   : > { %v617_v21 = vpop.eup %616 }
  0xa4   : > { %v619_v22 = vpop.eup %618  ;;  %v419_v23 = vmul.f32 0.6931472, %v617_v21 }
  0xa5   : > { %v424_v24 = vmul.f32 0.6931472, %v619_v22 }
  0xa7   : > { %v425_v25 = vsub.f32 %v424_v24, %v419_v23 }
  0xa9   : > { %v426_v26 = vmul.f32 -8.0, %v425_v25 }
  0xab   : > { %v428_v27 = vand.u32 2147483647, %v426_v26  ;;  %v427_v36 = vmax.f32 %v426_v26, 0.0 }
  0xad   : > { %v429_v28 = vsub.f32 0.0, %v428_v27 }
  0xaf   : > { %v430_v29 = vmul.f32 1.442695, %v429_v28 }
  0xb1   : > { %620 = vpow2.f32 %v430_v29 }
  0xbb   : > { %v621_v30 = vpop.eup %620 }
  0xbc   : > { %v432_v31 = vadd.f32 1.0, %v621_v30 }
  0xbd   : > { %v371_v32 = vpop.xlane.xlu0 %370 }
  0xbe   : > { %v372_v33 = vsub.f32 %v366_v3, %v371_v32  ;;  %622 = vlog2.f32 %v432_v31 }
  0xc0   : > { %v373_v34 = vmul.f32 1.442695, %v372_v33 }
  0xc2   : > { %624 = vpow2.f32 %v373_v34 }
  0xc8   : > { %v623_v35 = vpop.eup %622 }
  0xc9   : > { %v434_v37 = vmul.f32 0.6931472, %v623_v35 }
  0xcb   : > { %v435_v38 = vadd.f32 %v434_v37, %v427_v36 }
  0xcc   : > { %v625_v39 = vpop.eup %624 }
  0xcd   : > { %436 = vadd.xlane.f32.xlu0 %v435_v38  ;;  %v375_v40 = vsel %vm368_vm0, %v625_v39, 0.0 }
  0xce   : > { %376 = vadd.xlane.f32.xlu1 %v375_v40 }
 0x122   : > { %v391_v41 = vpop.xlane.xlu0 %390 }
 0x15a   : > { %v437_v43 = vpop.xlane.xlu0 %436 }
 0x15b   : > { %v438_v44 = vmul.f32 %v437_v43, %v367_v42  ;;  %v377_v45 = vpop.xlane.xlu1 %376 }
 0x15c   : > { %626 = vlog2.f32 %v377_v45 }
 0x15d   : > { %v439_v46 = vsel %vm394_vm2, %v438_v44, 0.0 }
 0x15e   : > { %440 = vadd.xlane.f32.xlu0 %v439_v46 }
 0x166   : > { %v627_v47 = vpop.eup %626 }
 0x167   : > { %v379_v48 = vmul.f32 0.6931472, %v627_v47 }
 0x169   : > { %v380_v49 = vadd.f32 %v379_v48, %v371_v32 }
 0x16b   : > { %v392_v50 = vsub.f32 %v380_v49, %v391_v41 }
 0x16d   : > { %v393_v51 = vmul.f32 %v392_v50, %v367_v42 }
 0x16f   : > { %v395_v52 = vsel %vm394_vm2, %v393_v51, 0.0 }
 0x170   : > { %396 = vadd.xlane.f32.xlu1 %v395_v52 }
 0x1eb   : > { %v441_v53 = vpop.xlane.xlu0 %440 }
 0x1ec   : > { %v442_v54 = vrot.slane %v441_v53, 4 }
 0x1ee   : > { %v443_v55 = vadd.f32 %v442_v54, %v441_v53 }
 0x1f0   : > { %v444_v56 = vrot.slane %v443_v55, 2 }
 0x1f2   : > { %v445_v60 = vadd.f32 %v444_v56, %v443_v55 }
 0x1f4   : > { %v446_v63 = vrot.slane %v445_v60, 1 }
 0x1f6   : > { %v447_v2 = vadd.f32 %v446_v63, %v445_v60 }
 0x1fd   : > { %v397_v57 = vpop.xlane.xlu1 %396 }
 0x1fe   : > { %v398_v58 = vrot.slane %v397_v57, 4 }
 0x200   : > { %v399_v59 = vadd.f32 %v398_v58, %v397_v57 }
 0x202   : > { %v400_v61 = vrot.slane %v399_v59, 2 }
 0x204   : > { %v401_v62 = vadd.f32 %v400_v61, %v399_v59 }
 0x206   : > { %v402_v0 = vrot.slane %v401_v62, 1 }
 0x208   : > { %v403_v1 = vadd.f32 %v402_v0, %v401_v62 }
 0x20a   : > { %601 = vpush %v403_v1 }
 0x20b   : > { %603 = vpush %v447_v2 }
 0x23b   : > { %s602_s27 = spop %601 }
 0x23c   : > { %v451_v3 = vstv %s602_s27  ;;  %s604_s28 = spop %603 }
 0x23d   : > { %453 = vst.msk [vmem:[%s362_s26] sm:$0x1] %vm452_vm3, %v451_v3  ;;  %s449_s29 = ssub.f32 0.0, %s604_s28 }
 0x23f   : > { %s450_s10 = smul.f32 1.442695, %s449_s29 }
 0x241   : > { %v454_v4 = vstv %s450_s10 }
 0x242   : > { %455 = vst.msk [vmem:[%s365_s9] sm:$0x1] %vm452_vm3, %v454_v4 }
 0x243 PF: > { %s18_s24 = sadd.s32 1, %s634_s24  }
 0x244   : > { %p15_p4 = scmp.ge.s32.totalorder %s18_s24, 6  }
 0x246   :  { %17 = sbr.rel (!%p15_p4) target bundleno = 1 (0x1), region = 101 }

</bundles_post_ra>
